<compile_context>
chip_gen: v7x
topology: tpu7x:2x2x1
jax: 0.10.0
libtpu: 0.0.40
codegen_flags: <defaults>
</compile_context>

<pallas_src>
import jax
import jax.numpy as jnp
from jax.experimental import pallas as pl
from jax.experimental.pallas import tpu as pltpu


def _round_up(x, m):
    return (x + m - 1) // m * m


def _patch_embed_kernel(p_ref, w_ref, b_ref, o_ref):
    # p_ref : (TM, K_pad)   bfloat16   row tile of flattened patches
    # w_ref : (K_pad, TN)   bfloat16   column tile of flattened conv weight
    # b_ref : (1, TN)       float32    bias tile
    # o_ref : (TM, TN)      float32
    acc = jnp.dot(p_ref[...], w_ref[...], preferred_element_type=jnp.float32)
    o_ref[...] = (acc + b_ref[...]).astype(o_ref.dtype)


def patch_embed_forward(x, weight, bias, patch_size):
    """x: (B, C, H, W) NCHW; weight: (D, C, P, P); bias: (D,). Returns (B, NP, D) f32."""
    B, C, H, W = x.shape
    D = weight.shape[0]
    P = patch_size
    assert H % P == 0 and W % P == 0
    Hp, Wp = H // P, W // P
    num_patches = Hp * Wp
    K = C * P * P
    M = B * num_patches

    # --- layout glue (XLA): extract non-overlapping patches in (c, di, dj) order,
    # fold batch into the row dim.  Cast to bf16 first so the materialized
    # intermediate is half-size and the MXU runs at its native bf16 rate.
    xb = x.astype(jnp.bfloat16)
    xp = xb.reshape(B, C, Hp, P, Wp, P).transpose(0, 2, 4, 1, 3, 5)  # (B,Hp,Wp,C,P,P)
    patches = xp.reshape(M, K)                                       # (B*NP, K) bf16

    w_flat = weight.reshape(D, K).T.astype(jnp.bfloat16)             # (K, D) bf16
    b_row = bias.reshape(1, D).astype(jnp.float32)                   # (1, D) f32

    # --- tiling / padding (lane = 128).  On v5e keep TM/TN at 128 (4x128^2 MXU,
    # tighter scoped VMEM); 256 fills v6e/v7x's 2x256^2 MXU.
    TM = 256 if M >= 256 else 128
    K_pad = _round_up(K, 128)
    D_pad = _round_up(D, 128)
    TN = 256 if (D_pad % 256 == 0) else 128
    M_pad = _round_up(M, TM)

    patches_p = jnp.pad(patches, ((0, M_pad - M), (0, K_pad - K)))
    w_p = jnp.pad(w_flat, ((0, K_pad - K), (0, D_pad - D)))
    b_p = jnp.pad(b_row, ((0, 0), (0, D_pad - D)))

    num_m = M_pad // TM
    num_n = D_pad // TN

    out = pl.pallas_call(
        _patch_embed_kernel,
        out_shape=jax.ShapeDtypeStruct((M_pad, D_pad), jnp.float32),
        grid_spec=pltpu.PrefetchScalarGridSpec(
            num_scalar_prefetch=0,
            # m is the innermost axis -> the (K_pad, TN) weight block index is
            # constant across consecutive steps and stays resident in VMEM.
            grid=(num_n, num_m),
            in_specs=[
                pl.BlockSpec((TM, K_pad), lambda n, m: (m, 0)),
                pl.BlockSpec((K_pad, TN), lambda n, m: (0, n)),
                pl.BlockSpec((1, TN), lambda n, m: (0, n)),
            ],
            out_specs=pl.BlockSpec((TM, TN), lambda n, m: (m, n)),
        ),
        compiler_params=pltpu.CompilerParams(
            dimension_semantics=("parallel", "parallel")),
    )(patches_p, w_p, b_p)

    # Slice off padding, restore (B, num_patches, embed_dim).
    return out[:M, :D].reshape(B, num_patches, D)


if __name__ == "__main__":
    # Small shapes consistent with the module: img_size=16, patch_size=4,
    # in_chans=4, embed_dim=32 -> num_patches = 16.
    B, C, H, W = 2, 4, 16, 16
    P = 4
    D = 32

    key = jax.random.PRNGKey(0)
    kx, kw, kb = jax.random.split(key, 3)
    x = jax.random.normal(kx, (B, C, H, W), dtype=jnp.float32)
    weight = jax.random.normal(kw, (D, C, P, P), dtype=jnp.float32) * 0.02
    bias = jax.random.normal(kb, (D,), dtype=jnp.float32) * 0.02

    out = patch_embed_forward(x, weight, bias, P)
    out = jax.block_until_ready(out)

    # Reference: same math as nn.Conv2d(kernel=stride=P) + flatten(2).transpose(1,2),
    # with operands rounded to bf16 (as the kernel does) and f32 accumulation.
    Hp, Wp = H // P, W // P
    xp = x.reshape(B, C, Hp, P, Wp, P).transpose(0, 2, 4, 1, 3, 5)
    patches_ref = xp.reshape(B, Hp * Wp, C * P * P)
    patches_ref = patches_ref.astype(jnp.bfloat16).astype(jnp.float32)
    w_ref = weight.reshape(D, -1).astype(jnp.bfloat16).astype(jnp.float32)
    ref = jnp.einsum("bpk,dk->bpd", patches_ref, w_ref) + bias

    assert out.shape == (B, Hp * Wp, D)
    assert jnp.allclose(out, ref, atol=1e-3, rtol=1e-3)
    print("KERNEL_OK")
</pallas_src>

<mosaic_0001>
module attributes {stable_mosaic.version = 11 : i64} {
  func.func @_patch_embed_kernel(%arg0: i32, %arg1: i32, %arg2: memref<128x128xbf16, #tpu.memory_space<vmem>>, %arg3: memref<128x128xbf16, #tpu.memory_space<vmem>>, %arg4: memref<1x128xf32, #tpu.memory_space<vmem>>, %arg5: memref<128x128xf32, #tpu.memory_space<vmem>>) attributes {dimension_semantics = [#tpu.dimension_semantics<parallel>, #tpu.dimension_semantics<parallel>], iteration_bounds = array<i64: 1, 1>, scalar_prefetch = 0 : i64, scratch_operands = 0 : i64, tpu.core_type = #tpu.core_type<tc>, window_params = [{transform_indices = @transform_0, window_bounds = array<i64: 128, 128>}, {transform_indices = @transform_1, window_bounds = array<i64: 128, 128>}, {transform_indices = @transform_2, window_bounds = array<i64: 1, 128>}, {transform_indices = @transform_3, window_bounds = array<i64: 128, 128>}]} {
    %c0 = arith.constant 0 : index
    %c0_0 = arith.constant 0 : index
    %0 = vector.load %arg2[%c0, %c0_0] : memref<128x128xbf16, #tpu.memory_space<vmem>>, vector<128x128xbf16>
    %c0_1 = arith.constant 0 : index
    %c0_2 = arith.constant 0 : index
    %1 = vector.load %arg3[%c0_1, %c0_2] : memref<128x128xbf16, #tpu.memory_space<vmem>>, vector<128x128xbf16>
    %cst = arith.constant dense<0.000000e+00> : vector<128x128xf32>
    %2 = tpu.matmul %0, %1, %cst {dimension_numbers = #tpu.dot_dimension_numbers<[1], [0], [0], [1], [0, 0, 1, 1], [], []>} : vector<128x128xbf16>, vector<128x128xbf16>, vector<128x128xf32> -> vector<128x128xf32>
    %c0_3 = arith.constant 0 : index
    %c0_4 = arith.constant 0 : index
    %3 = vector.load %arg4[%c0_3, %c0_4] : memref<1x128xf32, #tpu.memory_space<vmem>>, vector<1x128xf32>
    %4 = vector.broadcast %3 : vector<1x128xf32> to vector<128x128xf32>
    %5 = arith.addf %2, %4 : vector<128x128xf32>
    %c0_5 = arith.constant 0 : index
    %c0_6 = arith.constant 0 : index
    %6 = vector.load %arg5[%c0_5, %c0_6] : memref<128x128xf32, #tpu.memory_space<vmem>>, vector<128x128xf32>
    tpu.vector_store %arg5[%c0_5, %c0_6], %5 {strides = array<i32>} : memref<128x128xf32, #tpu.memory_space<vmem>>, vector<128x128xf32>,
    return
  }
  func.func @transform_0(%arg0: i32, %arg1: i32) -> (i32, i32) {
    %c0_i32 = arith.constant 0 : i32
    %c0_i32_0 = arith.constant 0 : i32
    return %arg1, %c0_i32 : i32, i32
  }
  func.func @transform_1(%arg0: i32, %arg1: i32) -> (i32, i32) {
    %c0_i32 = arith.constant 0 : i32
    %c0_i32_0 = arith.constant 0 : i32
    return %c0_i32, %arg0 : i32, i32
  }
  func.func @transform_2(%arg0: i32, %arg1: i32) -> (i32, i32) {
    %c0_i32 = arith.constant 0 : i32
    %c0_i32_0 = arith.constant 0 : i32
    return %c0_i32, %arg0 : i32, i32
  }
  func.func @transform_3(%arg0: i32, %arg1: i32) -> (i32, i32) {
    %c0_i32 = arith.constant 0 : i32
    return %arg1, %arg0 : i32, i32
  }
}

</mosaic_0001>

<bundles_post_ra>
// kernel: tpu_custom_call.1
= control target key start
LH: loop header
LB: loop body
LE: loop exit
PB: predicated region body
PF: predicated region fallthrough
CT: control target
= control target key end

     0   :  { %8 = vsyncpa [#allocation3], 0  ;;  %s552_s0 = inlined_call_operand.hbm [shape: bf16[128,128], index: 0, kind: input, shape index: {}]   ;;  %s553_s1 = inlined_call_operand.hbm [shape: bf16[128,128], index: 1, kind: input, shape index: {}]   ;;  %s554_s2 = inlined_call_operand.vmem [shape: f32[1,128], index: 2, kind: input, shape index: {}]   ;;  %s555_s3 = inlined_call_operand.hbm [shape: f32[128,128], index: 3, kind: output, shape index: {}]  }
   0x1   :  { %9 = vsyncpa [#allocation6], 0 }
   0x2   :  { %10 = vsyncpa [#allocation4], 0  ;;  %s486_s12 = smov [#allocation2]   ;;  %s414_s16 = scalar_lea.hbm %s552_s0, 1024 }
   0x3   :  { %s16_s13 = sshll.u32 %s486_s12, 4  ;;  %p415_p0 = scmp.ne.s32.totalorder %s552_s0, %s414_s16  ;;  %s17_s13 = int_to_ptr.vmem [resolvable:$true] %s16_s13 }
   0x4   :  { %p418_p1 = scmp.lt.u32.totalorder %s414_s16, %s552_s0 }
   0x6   :  { %p420_p2 = pnand %p418_p1, %p415_p0 }
   0x8   :  { %423 = shalt.err (!%p420_p2)
}
   0x9   :  { %s424_s21 = scalar_lea.vmem %s17_s13, 1024  ;;  %p429_p4 = scmp.lt.s32.totalorder %s17_s13, %s17_s13 }
   0xa   :  { %p425_p3 = scmp.ne.s32.totalorder %s17_s13, %s424_s21  ;;  %p430_p5 = scmp.lt.s32.totalorder %s424_s21, %s424_s21 }
   0xc   :  { %p431_p6 = por %p430_p5, %p429_p4 }
   0xe   :  { %p432_p7 = pnand %p431_p6, %p425_p3 }
  0x10   :  { %435 = shalt.err (!%p432_p7)
}
  0x11   :  { %s487_s22 = smov 64   ;;  %s488_s23 = smov 4  }
  0x12   :  { %22 = dma.hbm_to_vmem [thread:$0]  %s552_s0, 1024, %s17_s13, [#allocation3], %s487_s22, %s487_s22, %s488_s23  }
  0x13   :  { %s489_s26 = smov [#allocation5]   ;;  %s436_s30 = scalar_lea.hbm %s553_s1, 1024 }
  0x14   :  { %s28_s27 = sshll.u32 %s489_s26, 4  ;;  %p437_p8 = scmp.ne.s32.totalorder %s553_s1, %s436_s30  ;;  %s29_s27 = int_to_ptr.vmem [resolvable:$true] %s28_s27 }
  0x15   :  { %p440_p9 = scmp.lt.u32.totalorder %s436_s30, %s553_s1 }
  0x17   :  { %p442_p10 = pnand %p440_p9, %p437_p8 }
  0x19   :  { %445 = shalt.err (!%p442_p10)
}
  0x1a   :  { %s446_s8 = scalar_lea.vmem %s29_s27, 1024  ;;  %p451_p12 = scmp.lt.s32.totalorder %s29_s27, %s29_s27 }
  0x1b   :  { %p447_p11 = scmp.ne.s32.totalorder %s29_s27, %s446_s8  ;;  %p452_p13 = scmp.lt.s32.totalorder %s446_s8, %s446_s8 }
  0x1d   :  { %p453_p0 = por %p452_p13, %p451_p12 }
  0x1f   :  { %p454_p1 = pnand %p453_p0, %p447_p11 }
  0x21   :  { %457 = shalt.err (!%p454_p1)
}
  0x22   :  { %34 = dma.hbm_to_vmem [thread:$0]  %s553_s1, 1024, %s29_s27, [#allocation6], %s487_s22, %s487_s22, %s488_s23  }
  0x23   :  { %480 = dma.done.wait [#allocation3], 1024  }
  0x24   :  { %481 = vsyncadd [#allocation3], 4294966272 }
  0x25   :  { %482 = dma.done.wait [#allocation6], 1024  }
  0x26   :  { %483 = vsyncadd [#allocation6], 4294966272  ;;  %v398_v0 = vld [vmem:[#allocation5] sm:$0xff]   ;;  %v399_v1 = vld [vmem:[#allocation5 + $0x8] sm:$0xff]  }
  0x27   :  { %343 = vmatprep.subr.bf16.mxu0 %v398_v0  ;;  %375 = vmatprep.subr.bf16.mxu1 %v398_v0  ;;  %v400_v2 = vld [vmem:[#allocation5 + $0x10] sm:$0xff]   ;;  %v401_v3 = vld [vmem:[#allocation5 + $0x18] sm:$0xff]   ;;  %v406_v4 = vld [vmem:[#allocation2] sm:$0xff]  }
  0x28   :  { %344 = vmatpush3.bf16.msra.mxu0 %v398_v0  ;;  %383 = vmatpush3.bf16.msra.mxu1 %v398_v0  ;;  %v407_v5 = vld [vmem:[#allocation2 + $0x20] sm:$0xff]   ;;  %v403_v7 = vld [vmem:[#allocation5 + $0x28] sm:$0xff]   ;;  %v404_v8 = vld [vmem:[#allocation5 + $0x30] sm:$0xff]  }
  0x29   :  { %345 = vmatprep.subr.bf16.mxu0 %v399_v1  ;;  %376 = vmatprep.subr.bf16.mxu1 %v399_v1  ;;  %v402_v6 = vld [vmem:[#allocation5 + $0x20] sm:$0xff]   ;;  %v405_v9 = vld [vmem:[#allocation5 + $0x38] sm:$0xff]   ;;  %v408_v10 = vld [vmem:[#allocation2 + $0x8] sm:$0xff]  }
  0x2a   :  { %359 = vmatprep.mubr.bf16.mxu0 %v406_v4  ;;  %367 = vmatprep.mubr.bf16.mxu1 %v407_v5  ;;  %v409_v11 = vld [vmem:[#allocation2 + $0x28] sm:$0xff]   ;;  %v410_v12 = vld [vmem:[#allocation2 + $0x10] sm:$0xff]   ;;  %v412_v14 = vld [vmem:[#allocation2 + $0x18] sm:$0xff]  }
  0x2b   :  { %v411_v13 = vld [vmem:[#allocation2 + $0x30] sm:$0xff]   ;;  %v413_v15 = vld [vmem:[#allocation2 + $0x38] sm:$0xff]   ;;  %v310_v16 = vld [vmem:[%s554_s2] ss:$0 sm:$0xff]  ;;  %s490_s2 = smov [#allocation7]  }
  0x2c   :  { %346 = vmatpush3.bf16.msra.mxu0 %v399_v1  ;;  %384 = vmatpush3.bf16.msra.mxu1 %v399_v1  ;;  %s297_s11 = sshll.u32 %s490_s2, 4  ;;  %s298_s11 = int_to_ptr.vmem [resolvable:$true] %s297_s11 }
  0x2d   :  { %347 = vmatprep.subr.bf16.mxu0 %v400_v2  ;;  %377 = vmatprep.subr.bf16.mxu1 %v400_v2  ;;  %s458_s12 = scalar_lea.vmem %s298_s11, 2048  ;;  %p463_p3 = scmp.lt.s32.totalorder %s298_s11, %s298_s11 }
  0x2e   :  { %p459_p2 = scmp.ne.s32.totalorder %s298_s11, %s458_s12  ;;  %p464_p4 = scmp.lt.s32.totalorder %s458_s12, %s458_s12 }
  0x30   :  { %348 = vmatpush3.bf16.msra.mxu0 %v400_v2  ;;  %385 = vmatpush3.bf16.msra.mxu1 %v400_v2  ;;  %p465_p5 = por %p464_p4, %p463_p3 }
  0x31   :  { %349 = vmatprep.subr.bf16.mxu0 %v401_v3  ;;  %378 = vmatprep.subr.bf16.mxu1 %v401_v3 }
  0x32   :  { %p466_p6 = pnand %p465_p5, %p459_p2 }
  0x34   :  { %350 = vmatpush3.bf16.msra.mxu0 %v401_v3  ;;  %386 = vmatpush3.bf16.msra.mxu1 %v401_v3 }
  0x35   :  { %351 = vmatprep.subr.bf16.mxu0 %v402_v6  ;;  %379 = vmatprep.subr.bf16.mxu1 %v402_v6 }
  0x38   :  { %352 = vmatpush3.bf16.msra.mxu0 %v402_v6  ;;  %387 = vmatpush3.bf16.msra.mxu1 %v402_v6 }
  0x39   :  { %353 = vmatprep.subr.bf16.mxu0 %v403_v7  ;;  %380 = vmatprep.subr.bf16.mxu1 %v403_v7 }
  0x3c   :  { %354 = vmatpush3.bf16.msra.mxu0 %v403_v7  ;;  %388 = vmatpush3.bf16.msra.mxu1 %v403_v7 }
  0x3d   :  { %355 = vmatprep.subr.bf16.mxu0 %v404_v8  ;;  %381 = vmatprep.subr.bf16.mxu1 %v404_v8 }
  0x40   :  { %356 = vmatpush3.bf16.msra.mxu0 %v404_v8  ;;  %389 = vmatpush3.bf16.msra.mxu1 %v404_v8 }
  0x41   :  { %357 = vmatprep.subr.bf16.mxu0 %v405_v9  ;;  %382 = vmatprep.subr.bf16.mxu1 %v405_v9 }
  0x44   :  { %358 = vmatpush3.bf16.msra.mxu0 %v405_v9  ;;  %390 = vmatpush3.bf16.msra.mxu1 %v405_v9 }
  0x47   :  { %360 = vmatmul.mubr.bf16.vlgmr.msra.gmra.mrb[0].mxu0 %v408_v10  ;;  %368 = vmatmul.mubr.bf16.vlgmr.msra.gmra.mrb[0].mxu1 %v409_v11 }
  0x48   :  { %363 = vmatprep.mubr.bf16.mxu0 %v410_v12  ;;  %371 = vmatprep.mubr.bf16.mxu1 %v411_v13 }
  0x4f   :  { %364 = vmatmul.mubr.bf16.gmra.mrb[4].mxu0 %v412_v14  ;;  %372 = vmatmul.mubr.bf16.gmra.mrb[4].mxu1 %v413_v15 }
 0x11a   :  { %v361_v17 = vpop.f32.mrb[0].mxu0  ;;  %v369_v18 = vpop.f32.mrb[0].mxu1 }
 0x11b   :  { %v222_v19 = vadd.f32 %v361_v17, %v310_v16  ;;  %v254_v20 = vadd.f32 %v369_v18, %v310_v16  ;;  %v213_v21 = vpop.f32.mrb[1].mxu0  ;;  %v245_v22 = vpop.f32.mrb[1].mxu1 }
 0x11c   :  { %v214_v23 = vadd.f32 %v310_v16, %v213_v21  ;;  %v246_v24 = vadd.f32 %v310_v16, %v245_v22  ;;  %v362_v25 = vpop.f32.mrb[2].mxu0  ;;  %v370_v26 = vpop.f32.mrb[2].mxu1 }
 0x11d   :  { %278 = vst [vmem:[#allocation7 + $0x10] sm:$0xff] %v222_v19  ;;  %286 = vst [vmem:[#allocation7 + $0x50] sm:$0xff] %v254_v20  ;;  %v225_v27 = vadd.f32 %v362_v25, %v310_v16  ;;  %v257_v28 = vadd.f32 %v370_v26, %v310_v16  ;;  %v216_v29 = vpop.f32.mrb[3].mxu0  ;;  %v248_v30 = vpop.f32.mrb[3].mxu1 }
 0x11e   :  { %276 = vst [vmem:[#allocation7] sm:$0xff] %v214_v23  ;;  %284 = vst [vmem:[#allocation7 + $0x40] sm:$0xff] %v246_v24  ;;  %v217_v31 = vadd.f32 %v310_v16, %v216_v29  ;;  %v249_v32 = vadd.f32 %v310_v16, %v248_v30 }
 0x11f   :  { %279 = vst [vmem:[#allocation7 + $0x18] sm:$0xff] %v225_v27  ;;  %287 = vst [vmem:[#allocation7 + $0x58] sm:$0xff] %v257_v28 }
 0x120   :  { %277 = vst [vmem:[#allocation7 + $0x8] sm:$0xff] %v217_v31  ;;  %285 = vst [vmem:[#allocation7 + $0x48] sm:$0xff] %v249_v32 }
 0x122   :  { %v365_v33 = vpop.f32.mrb[4].mxu0  ;;  %v373_v34 = vpop.f32.mrb[4].mxu1 }
 0x123   :  { %v238_v35 = vadd.f32 %v365_v33, %v310_v16  ;;  %v270_v36 = vadd.f32 %v373_v34, %v310_v16  ;;  %v229_v37 = vpop.f32.mrb[5].mxu0  ;;  %v261_v38 = vpop.f32.mrb[5].mxu1 }
 0x124   :  { %v230_v39 = vadd.f32 %v310_v16, %v229_v37  ;;  %v262_v40 = vadd.f32 %v310_v16, %v261_v38  ;;  %v366_v41 = vpop.f32.mrb[6].mxu0  ;;  %v374_v42 = vpop.f32.mrb[6].mxu1 }
 0x125   :  { %282 = vst [vmem:[#allocation7 + $0x30] sm:$0xff] %v238_v35  ;;  %290 = vst [vmem:[#allocation7 + $0x70] sm:$0xff] %v270_v36  ;;  %v241_v43 = vadd.f32 %v366_v41, %v310_v16  ;;  %v273_v44 = vadd.f32 %v374_v42, %v310_v16  ;;  %v232_v45 = vpop.f32.mrb[7].mxu0  ;;  %v264_v46 = vpop.f32.mrb[7].mxu1 }
 0x126   :  { %280 = vst [vmem:[#allocation7 + $0x20] sm:$0xff] %v230_v39  ;;  %288 = vst [vmem:[#allocation7 + $0x60] sm:$0xff] %v262_v40  ;;  %v233_v47 = vadd.f32 %v310_v16, %v232_v45  ;;  %v265_v48 = vadd.f32 %v310_v16, %v264_v46 }
 0x127   :  { %283 = vst [vmem:[#allocation7 + $0x38] sm:$0xff] %v241_v43  ;;  %291 = vst [vmem:[#allocation7 + $0x78] sm:$0xff] %v273_v44 }
 0x128   :  { %281 = vst [vmem:[#allocation7 + $0x28] sm:$0xff] %v233_v47  ;;  %289 = vst [vmem:[#allocation7 + $0x68] sm:$0xff] %v265_v48 }
 0x129   :  { %469 = shalt.err (!%p466_p6)
}
 0x12a   :  { %s470_s15 = scalar_lea.hbm %s555_s3, 2048 }
 0x12b   :  { %p471_p7 = scmp.ne.s32.totalorder %s555_s3, %s470_s15  ;;  %p474_p8 = scmp.lt.u32.totalorder %s470_s15, %s555_s3 }
 0x12d   :  { %p476_p9 = pnand %p474_p8, %p471_p7 }
 0x12f   :  { %479 = shalt.err (!%p476_p9)
}
 0x130   :  { %s491_s20 = smov 128   ;;  %s492_s21 = smov 8  }
 0x131   :  { %303 = dma.vmem_to_hbm [thread:$0]  %s298_s11, 2048, %s555_s3, [#allocation4], %s491_s20, %s491_s20, %s492_s21  }
 0x132   :  { %484 = dma.done.wait [#allocation4], 2048  }
 0x133   :  { %485 = vsyncadd [#allocation4], 4294965248 }
 0x134   :  { %307 = vsyncpa [#allocation3], 1 }
 0x135   :  { %308 = vsyncpa [#allocation6], 1 }
 0x136   :  { %309 = vsyncpa [#allocation4], 1 }

</bundles_post_ra>
